<compile_context>
chip_gen: v5e
topology: v5e:2x2
jax: 0.10.0
libtpu: 0.0.40
codegen_flags: <defaults>
</compile_context>

<pallas_src>
import functools

import jax
import jax.numpy as jnp
from jax.experimental import pallas as pl
from jax.experimental.pallas import tpu as pltpu


def _round_up(v, m):
    return (v + m - 1) // m * m


def _attention_pps_kernel(x_ref, w_ref, b_ref, o_ref):
    """One batch tile per grid step.

    x_ref: (TB, XW)  img-token activations for this batch tile.  Only the
                     first K = w_ref.shape[0] lanes are meaningful (XW == K
                     when C % 128 == 0, else XW == S*C and we slice).
    w_ref: (K, Np)   fused weight  W[c, n] = sum_j wkv[C+j, c] * wproj[n, j]
                     (VMEM-resident across all grid steps).
    b_ref: (1, Np)   proj bias, f32, column-padded.
    o_ref: (TB, Np)
    """
    k = w_ref.shape[0]
    acc = jnp.dot(x_ref[:, :k], w_ref[...], preferred_element_type=jnp.float32)
    o_ref[...] = (acc + b_ref[...]).astype(o_ref.dtype)


@functools.partial(jax.jit, static_argnames=("num_heads", "block_b"))
def attention_pps(x, wkv, wproj, bproj, num_heads, block_b=1024):
    """x: (B, S, C); wkv: (2C, C) torch layout; wproj: (C, C); bproj: (C,)."""
    B, S, C = x.shape
    N = S - 1
    assert N == 1, "torch reshape in Attention_pps requires exactly 1 pps token"
    assert C % num_heads == 0
    # num_heads is semantically inert here: with attn == 1 per head, the
    # per-head (attn @ v) followed by concat reassembles v_img exactly.

    # ---- wrapper-side weight fusion (exact algebra, done once per call) ----
    # kv(x) columns [0:C) are k, [C:2C) are v.  Fused W[c, n] computed with a
    # single dot_general (no materialized transposes) at HIGHEST precision.
    w_v = wkv[C:, :]                                           # (C, C) v-half
    w_fused = jax.lax.dot_general(
        w_v, wproj,
        dimension_numbers=(((0,), (1,)), ((), ())),
        precision=jax.lax.Precision.HIGHEST,
        preferred_element_type=jnp.float32,
    ).astype(x.dtype)                                          # (C, C)
    bias = bproj.astype(jnp.float32).reshape(1, C)

    # Lane-dense output columns: pad W / bias / output to a multiple of 128.
    cp = _round_up(C, 128)
    if cp != C:
        w_fused = jnp.pad(w_fused, ((0, 0), (0, cp - C)))
        bias = jnp.pad(bias, ((0, 0), (0, cp - C)))

    # Fold the img-row selection into the BlockSpec: view x as (B, S*C)
    # (contiguous trailing-dim merge -> bitcast, no HBM copy) and DMA only the
    # first C columns of each row (= the img token) per batch tile.
    x2 = x.reshape(B, S * C)
    xw = C if C % 128 == 0 else S * C   # fall back to full width if unaligned

    # ---- batch-tile selection ----
    tb = min(block_b, B)
    if B >= 256 and pl.cdiv(B, tb) < 2:
        # Guarantee >= 2 grid steps so the "parallel" axis can shard across
        # both v7x TensorCores (measured-neutral on 1-TC v5e/v6e).
        tb = _round_up(pl.cdiv(B, 2), 8)

    x_item = x.dtype.itemsize
    o_item = x.dtype.itemsize
    w_item = w_fused.dtype.itemsize

    def _vmem_needed(t):
        return (2 * t * xw * x_item            # x tile, double-buffered
                + 2 * t * cp * o_item          # out tile, double-buffered
                + C * cp * w_item              # resident fused W
                + 8 * cp * 4)                  # bias (sublane-padded)

    budget = 40 << 20                          # safe on v7x's 64 MiB VMEM too
    while _vmem_needed(tb) > budget and tb > 8:
        tb = max(8, _round_up(tb // 2, 8))
    # TODO(synk): for very large C (W alone exceeding the budget, roughly
    # C > ~2800 in f32 on v7x) add an output-column grid axis that tiles W
    # instead of keeping it whole/resident.

    grid_b = pl.cdiv(B, tb)
    vmem_limit = int(min(max(_vmem_needed(tb) * 1.25 + (2 << 20), 32 << 20),
                         60 << 20))

    cost = pl.CostEstimate(
        flops=2 * B * C * cp,
        transcendentals=0,
        bytes_accessed=(B * C * x_item + B * cp * o_item
                        + C * cp * w_item + cp * 4),
    )

    out2d = pl.pallas_call(
        _attention_pps_kernel,
        out_shape=jax.ShapeDtypeStruct((B, cp), x.dtype),
        grid=(grid_b,),
        in_specs=[
            pl.BlockSpec((tb, xw), lambda i: (i, 0)),    # img-row tile of x
            pl.BlockSpec((C, cp), lambda i: (0, 0)),     # fused W (resident)
            pl.BlockSpec((1, cp), lambda i: (0, 0)),     # bias (resident)
        ],
        out_specs=pl.BlockSpec((tb, cp), lambda i: (i, 0)),
        compiler_params=pltpu.CompilerParams(
            dimension_semantics=("parallel",),
            vmem_limit_bytes=vmem_limit),
        cost_estimate=cost,
    )(x2, w_fused, bias)

    if cp != C:
        out2d = out2d[:, :C]
    return out2d.reshape(B, N, C)


def ref_forward(x, wkv, wproj, bproj, num_heads):
    """Pure-JAX mirror of the torch forward (for verification)."""
    x_img = x[:, :1, :]
    x_pps = x[:, 1:, :]
    B, N, C = x_pps.shape
    H = num_heads
    D = C // H
    scale = D ** -0.5

    kv_img = (x_img @ wkv.T).reshape(B, N, 2, H, D).transpose(2, 0, 3, 1, 4)
    kv_pps = (x_pps @ wkv.T).reshape(B, N, 2, H, D).transpose(2, 0, 3, 1, 4)
    k_img, v_img = kv_img[0], kv_img[1]
    k_pps, v_pps = kv_pps[0], kv_pps[1]

    q_pps = x_pps.reshape(B, -1, H, D).transpose(0, 2, 1, 3)
    attn = (q_pps @ jnp.swapaxes(k_pps, -2, -1)) * scale
    attn = jax.nn.softmax(attn, axis=-1)
    out = (attn @ v_img).transpose(0, 2, 1, 3).reshape(B, N, C)
    return out @ wproj.T + bproj


if __name__ == "__main__":
    B, num_heads, C = 8, 8, 128       # head_dim = 16
    S = 2                             # 1 img token + N=1 pps token

    key = jax.random.PRNGKey(0)
    kx, kkv, kp, kb = jax.random.split(key, 4)
    x = jax.random.normal(kx, (B, S, C), jnp.float32)
    wkv = jax.random.normal(kkv, (2 * C, C), jnp.float32) * 0.02   # torch (out, in)
    wproj = jax.random.normal(kp, (C, C), jnp.float32) * 0.02
    bproj = jax.random.normal(kb, (C,), jnp.float32) * 0.02

    out = attention_pps(x, wkv, wproj, bproj, num_heads)
    out = jax.block_until_ready(out)

    ref = ref_forward(x, wkv, wproj, bproj, num_heads)
    assert out.shape == (B, S - 1, C), out.shape
    err = float(jnp.max(jnp.abs(out - ref)))
    denom = float(jnp.max(jnp.abs(ref))) + 1e-6
    # Tolerance accounts for default (bf16-pass) MXU precision differences
    # between the fused-weight kernel path and the two-GEMM reference.
    assert err / denom < 2e-2, f"relative error too large: {err / denom}"
    print("KERNEL_OK")
</pallas_src>

<mosaic_0001>
module attributes {stable_mosaic.version = 11 : i64} {
  func.func @_attention_pps_kernel(%arg0: i32, %arg1: memref<8x128xf32, #tpu.memory_space<vmem>>, %arg2: memref<128x128xf32, #tpu.memory_space<vmem>>, %arg3: memref<1x128xf32, #tpu.memory_space<vmem>>, %arg4: memref<8x128xf32, #tpu.memory_space<vmem>>) attributes {dimension_semantics = [#tpu.dimension_semantics<parallel>], iteration_bounds = array<i64: 1>, scalar_prefetch = 0 : i64, scratch_operands = 0 : i64, tpu.core_type = #tpu.core_type<tc>, window_params = [{transform_indices = @transform_0, window_bounds = array<i64: 8, 128>}, {pipeline_mode = #tpu.pipeline_mode<synchronous>, transform_indices = @transform_1, window_bounds = array<i64: 128, 128>}, {pipeline_mode = #tpu.pipeline_mode<synchronous>, transform_indices = @transform_2, window_bounds = array<i64: 1, 128>}, {transform_indices = @transform_3, window_bounds = array<i64: 8, 128>}]} {
    %c0 = arith.constant 0 : index
    %c0_0 = arith.constant 0 : index
    %0 = vector.load %arg1[%c0, %c0_0] : memref<8x128xf32, #tpu.memory_space<vmem>>, vector<8x128xf32>
    %c0_1 = arith.constant 0 : index
    %c0_2 = arith.constant 0 : index
    %1 = vector.load %arg2[%c0_1, %c0_2] : memref<128x128xf32, #tpu.memory_space<vmem>>, vector<128x128xf32>
    %cst = arith.constant dense<0.000000e+00> : vector<8x128xf32>
    %2 = tpu.matmul %0, %1, %cst {dimension_numbers = #tpu.dot_dimension_numbers<[1], [0], [0], [1], [0, 0, 1, 1], [], []>} : vector<8x128xf32>, vector<128x128xf32>, vector<8x128xf32> -> vector<8x128xf32>
    %c0_3 = arith.constant 0 : index
    %c0_4 = arith.constant 0 : index
    %3 = vector.load %arg3[%c0_3, %c0_4] : memref<1x128xf32, #tpu.memory_space<vmem>>, vector<1x128xf32>
    %4 = vector.broadcast %3 : vector<1x128xf32> to vector<8x128xf32>
    %5 = arith.addf %2, %4 : vector<8x128xf32>
    %c0_5 = arith.constant 0 : index
    %c0_6 = arith.constant 0 : index
    %6 = vector.load %arg4[%c0_5, %c0_6] : memref<8x128xf32, #tpu.memory_space<vmem>>, vector<8x128xf32>
    tpu.vector_store %arg4[%c0_5, %c0_6], %5 {strides = array<i32>} : memref<8x128xf32, #tpu.memory_space<vmem>>, vector<8x128xf32>,
    return
  }
  func.func @transform_0(%arg0: i32) -> (i32, i32) {
    %c0_i32 = arith.constant 0 : i32
    %c0_i32_0 = arith.constant 0 : i32
    return %arg0, %c0_i32 : i32, i32
  }
  func.func @transform_1(%arg0: i32) -> (i32, i32) {
    %c0_i32 = arith.constant 0 : i32
    %c0_i32_0 = arith.constant 0 : i32
    %c0_i32_1 = arith.constant 0 : i32
    return %c0_i32, %c0_i32_0 : i32, i32
  }
  func.func @transform_2(%arg0: i32) -> (i32, i32) {
    %c0_i32 = arith.constant 0 : i32
    %c0_i32_0 = arith.constant 0 : i32
    %c0_i32_1 = arith.constant 0 : i32
    return %c0_i32, %c0_i32_0 : i32, i32
  }
  func.func @transform_3(%arg0: i32) -> (i32, i32) {
    %c0_i32 = arith.constant 0 : i32
    %c0_i32_0 = arith.constant 0 : i32
    return %arg0, %c0_i32 : i32, i32
  }
}

</mosaic_0001>

<bundles_post_ra>
// kernel: attention_pps.1
= control target key start
LH: loop header
LB: loop body
LE: loop exit
PB: predicated region body
PF: predicated region fallthrough
CT: control target
= control target key end

     0   :  { %s179_s0 = inlined_call_operand.vmem [shape: f32[8,256], index: 0, kind: input, shape index: {}]   ;;  %s180_s1 = inlined_call_operand.vmem [shape: f32[128,128], index: 1, kind: input, shape index: {}]   ;;  %s181_s2 = inlined_call_operand.vmem [shape: f32[1,128], index: 2, kind: input, shape index: {}]   ;;  %s182_s3 = inlined_call_operand.hbm [shape: f32[8,128], index: 3, kind: output, shape index: {}]  }
   0x1   :  { %v31_v0 = vld [vmem:[%s180_s1 + $0x78] sm:$0xff]  ;;  %v30_v1 = vld [vmem:[%s180_s1 + $0x70] sm:$0xff]  ;;  %v29_v2 = vld [vmem:[%s180_s1 + $0x68] sm:$0xff] }
   0x2   :  { %36 = vmatpush.msra.mxu0 %v31_v0  ;;  %v28_v3 = vld [vmem:[%s180_s1 + $0x60] sm:$0xff]  ;;  %v27_v4 = vld [vmem:[%s180_s1 + $0x58] sm:$0xff] }
   0x4   :  { %37 = vmatpush.msra.mxu0 %v30_v1 }
   0x6   :  { %38 = vmatpush.msra.mxu0 %v29_v2 }
   0x7   :  { %8 = vsyncpa [#allocation3], 0  ;;  %v26_v5 = vld [vmem:[%s180_s1 + $0x50] sm:$0xff]  ;;  %v25_v6 = vld [vmem:[%s180_s1 + $0x48] sm:$0xff]  ;;  %s101_s21 = smov [#allocation2]   ;;  %s64_s25 = sshll.u32 %s182_s3, 4  ;;  %s65_s25 = int_to_ptr.hbm [resolvable:$true] %s64_s25 }
   0x8   :  { %39 = vmatpush.msra.mxu0 %v28_v3  ;;  %v24_v7 = vld [vmem:[%s180_s1 + $0x40] sm:$0xff]  ;;  %v23_v8 = vld [vmem:[%s180_s1 + $0x38] sm:$0xff]  ;;  %v22_v9 = vld [vmem:[%s180_s1 + $0x30] sm:$0xff]  ;;  %s62_s22 = sshll.u32 %s101_s21, 4  ;;  %s63_s22 = int_to_ptr.vmem [resolvable:$true] %s62_s22 }
   0x9   :  { %v21_v10 = vld [vmem:[%s180_s1 + $0x28] sm:$0xff]  ;;  %v20_v11 = vld [vmem:[%s180_s1 + $0x20] sm:$0xff]  ;;  %v19_v12 = vld [vmem:[%s180_s1 + $0x18] sm:$0xff] }
   0xa   :  { %40 = vmatpush.msra.mxu0 %v27_v4  ;;  %v18_v13 = vld [vmem:[%s180_s1 + $0x10] sm:$0xff]  ;;  %v17_v14 = vld [vmem:[%s180_s1 + $0x8] sm:$0xff]  ;;  %v16_v15 = vld [vmem:[%s180_s1] sm:$0xff] }
   0xb   :  { %v15_v16 = vld [vmem:[%s179_s0] sm:$0xff] }
   0xc   :  { %41 = vmatpush.msra.mxu0 %v26_v5  ;;  %v74_v17 = vld [vmem:[%s181_s2] ss:$0 sm:$0xff] }
   0xe   :  { %42 = vmatpush.msra.mxu0 %v25_v6 }
  0x10   :  { %43 = vmatpush.msra.mxu0 %v24_v7 }
  0x12   :  { %44 = vmatpush.msra.mxu0 %v23_v8 }
  0x14   :  { %45 = vmatpush.msra.mxu0 %v22_v9 }
  0x16   :  { %46 = vmatpush.msra.mxu0 %v21_v10 }
  0x18   :  { %47 = vmatpush.msra.mxu0 %v20_v11 }
  0x1a   :  { %48 = vmatpush.msra.mxu0 %v19_v12 }
  0x1c   :  { %49 = vmatpush.msra.mxu0 %v18_v13 }
  0x1e   :  { %50 = vmatpush.msra.mxu0 %v17_v14 }
  0x20   :  { %51 = vmatpush.msra.mxu0 %v16_v15 }
  0x21   :  { %52 = vmatmul.f32.vlgmr.msra.gmra.mxu0 %v15_v16 }
  0x9e   :  { %v53_v18 = vpop.f32.mrf.mxu0 }
  0x9f   :  { %v54_v19 = vadd.f32 %v74_v17, %v53_v18 }
  0xa1   :  { %56 = vst [vmem:[#allocation2] sm:$0xff] %v54_v19 }
  0xa2   :  { %67 = dma.vmem_to_hbm [thread:$0]  %s63_s22, 128, %s65_s25, [#allocation3]  }
  0xa3   :  { %99 = dma.done.wait [#allocation3], 128  }
  0xa4   :  { %100 = vsyncadd [#allocation3], 4294967168 }
  0xa5   :  { %72 = vsyncpa [#allocation3], 1 }

</bundles_post_ra>
